<compile_context>
chip_gen: v7x
topology: tpu7x:2x2x1
jax: 0.10.0
libtpu: 0.0.40
codegen_flags: <defaults>
</compile_context>

<pallas_src>
import functools
import math

import jax
import jax.numpy as jnp
from jax import lax
from jax.experimental import pallas as pl
from jax.experimental.pallas import tpu as pltpu

LN_EPS = 1e-12
_VMEM_LIMIT = 48 * 1024 * 1024  # safe on v5e/v6e (128 MiB) and v7x (64 MiB)


# ----------------------------------------------------------------------------
# helpers
# ----------------------------------------------------------------------------
def _gelu(x):
    # tanh approximation of GELU (matches typical layerUtils.GELU)
    c = 0.7978845608028654
    return 0.5 * x * (1.0 + jnp.tanh(c * (x + 0.044715 * x * x * x)))


def _pick_tile(dim, candidates):
    """Largest candidate tile that evenly divides `dim`, else full extent."""
    for c in candidates:
        if dim % c == 0:
            return c
    return dim


# ----------------------------------------------------------------------------
# Fused tiled linear kernel: y = act(x @ w + b) [+ residual] [-> LayerNorm]
# ----------------------------------------------------------------------------
def _make_fused_linear_kernel(activation, has_residual, has_ln, eps):
    def kernel(*refs):
        x_ref, w_ref, b_ref = refs[0], refs[1], refs[2]
        i = 3
        res_ref = None
        if has_residual:
            res_ref = refs[i]
            i += 1
        g_ref = beta_ref = None
        if has_ln:
            g_ref, beta_ref = refs[i], refs[i + 1]
            i += 2
        o_ref, acc_ref = refs[i], refs[i + 1]

        k = pl.program_id(2)

        @pl.when(k == 0)
        def _():
            acc_ref[...] = jnp.zeros_like(acc_ref)

        acc_ref[...] += jnp.dot(x_ref[...], w_ref[...],
                                preferred_element_type=jnp.float32)

        @pl.when(k == pl.num_programs(2) - 1)
        def _():
            y = acc_ref[...] + b_ref[...]
            if activation == "gelu":
                y = _gelu(y)
            if has_residual:
                y = y + res_ref[...]
            if has_ln:
                mu = jnp.mean(y, axis=-1, keepdims=True)
                var = jnp.mean((y - mu) ** 2, axis=-1, keepdims=True)
                y = (y - mu) * lax.rsqrt(var + eps)
                y = y * g_ref[...] + beta_ref[...]
            o_ref[...] = y.astype(o_ref.dtype)

    return kernel


def fused_linear(x, w, b, *, activation=None, residual=None, ln=None, eps=LN_EPS):
    """x:(M,K) @ w:(K,N) + b, optional GELU, optional (+residual -> LayerNorm)."""
    M, K = x.shape
    N = w.shape[1]
    has_residual = residual is not None
    has_ln = ln is not None

    tm = _pick_tile(M, (256, 128, 64, 32, 16, 8))
    tk = _pick_tile(K, (512, 256, 128))
    # LayerNorm reduces over N -> keep the whole feature dim in one block.
    tn = N if has_ln else _pick_tile(N, (512, 256, 128))
    nm, nn, nk = M // tm, N // tn, K // tk

    kern = _make_fused_linear_kernel(activation, has_residual, has_ln, eps)

    in_specs = [
        pl.BlockSpec((tm, tk), lambda i, j, k: (i, k)),
        pl.BlockSpec((tk, tn), lambda i, j, k: (k, j)),
        pl.BlockSpec((1, tn), lambda i, j, k: (0, j)),
    ]
    args = [x, w, b.reshape(1, N)]
    if has_residual:
        in_specs.append(pl.BlockSpec((tm, tn), lambda i, j, k: (i, j)))
        args.append(residual)
    if has_ln:
        gamma, beta = ln
        in_specs.append(pl.BlockSpec((1, tn), lambda i, j, k: (0, j)))
        in_specs.append(pl.BlockSpec((1, tn), lambda i, j, k: (0, j)))
        args.extend([gamma.reshape(1, N), beta.reshape(1, N)])

    return pl.pallas_call(
        kern,
        out_shape=jax.ShapeDtypeStruct((M, N), jnp.float32),
        grid_spec=pltpu.PrefetchScalarGridSpec(
            num_scalar_prefetch=0,
            grid=(nm, nn, nk),
            in_specs=in_specs,
            out_specs=pl.BlockSpec((tm, tn), lambda i, j, k: (i, j)),
            scratch_shapes=[pltpu.VMEM((tm, tn), jnp.float32)],
        ),
        compiler_params=pltpu.CompilerParams(
            dimension_semantics=("parallel", "parallel", "arbitrary"),
            vmem_limit_bytes=_VMEM_LIMIT,
        ),
    )(*args)


# ----------------------------------------------------------------------------
# Multi-head self-attention on packed QKV, lane-dense (D on lanes)
# ----------------------------------------------------------------------------
def _attention_kernel(qkv_ref, o_ref, *, n_heads, d_head, scale, valid_len):
    d_model = n_heads * d_head
    qkv = qkv_ref[0]                                   # (Lp, 3D), lane-dense
    q = qkv[:, :d_model]
    k = qkv[:, d_model:2 * d_model]
    v = qkv[:, 2 * d_model:]
    Lp = q.shape[0]

    # Mask only the key positions introduced by sublane padding.
    key_pos = lax.broadcasted_iota(jnp.int32, (Lp, Lp), 1)
    bias = jnp.where(key_pos < valid_len, 0.0, -1e30).astype(jnp.float32)
    # TODO(synk): the reference builds a pad mask from integer token ids via
    # get_attention_pad_mask; CoBERT feeds float features, so no data-derived
    # pad mask is applied here (matches the previous behaviour).

    outs = []
    for h in range(n_heads):                           # static unroll over heads
        sl = slice(h * d_head, (h + 1) * d_head)
        qh, kh, vh = q[:, sl], k[:, sl], v[:, sl]
        # contract last axes directly -> no XLU transpose of K
        s = lax.dot_general(qh, kh, (((1,), (1,)), ((), ())),
                            preferred_element_type=jnp.float32) * scale + bias
        m = jnp.max(s, axis=-1, keepdims=True)
        p = jnp.exp(s - m)
        p = p * pl.reciprocal(jnp.sum(p, axis=-1, keepdims=True), approx=True)
        outs.append(jnp.dot(p, vh, preferred_element_type=jnp.float32))
    o_ref[0] = jnp.concatenate(outs, axis=-1).astype(o_ref.dtype)
    # TODO(synk): for long sequences convert to an online-softmax (flash) form
    # tiled over KV blocks so the (L, L) score matrix never materializes.


def attention(qkv, n_heads, valid_len):
    """qkv: (B, Lp, 3D) packed -> (B, Lp, D) attention output."""
    B, Lp, three_d = qkv.shape
    d_model = three_d // 3
    d_head = d_model // n_heads
    scale = 1.0 / math.sqrt(d_head)
    kern = functools.partial(_attention_kernel, n_heads=n_heads, d_head=d_head,
                             scale=scale, valid_len=valid_len)
    return pl.pallas_call(
        kern,
        out_shape=jax.ShapeDtypeStruct((B, Lp, d_model), jnp.float32),
        grid=(B,),
        in_specs=[pl.BlockSpec((1, Lp, three_d), lambda b: (b, 0, 0))],
        out_specs=pl.BlockSpec((1, Lp, d_model), lambda b: (b, 0, 0)),
        compiler_params=pltpu.CompilerParams(
            dimension_semantics=("parallel",),
            vmem_limit_bytes=_VMEM_LIMIT,
        ),
    )(qkv)


# ----------------------------------------------------------------------------
# Embedding add + LayerNorm over flattened rows
# ----------------------------------------------------------------------------
def _add_ln_kernel(x_ref, y_ref, g_ref, b_ref, o_ref, *, eps):
    h = x_ref[...] + y_ref[...]
    mu = jnp.mean(h, axis=-1, keepdims=True)
    var = jnp.mean((h - mu) ** 2, axis=-1, keepdims=True)
    o_ref[...] = ((h - mu) * lax.rsqrt(var + eps) * g_ref[...]
                  + b_ref[...]).astype(o_ref.dtype)


def add_layernorm(x, y, gamma, beta, eps=LN_EPS):
    """LayerNorm(x + y) over the last dim.  x, y: (M, D) flattened rows."""
    M, D = x.shape
    tm = _pick_tile(M, (512, 256, 128, 64, 32, 16, 8))
    kern = functools.partial(_add_ln_kernel, eps=eps)
    rspec = pl.BlockSpec((tm, D), lambda i: (i, 0))
    pspec = pl.BlockSpec((1, D), lambda i: (0, 0))
    return pl.pallas_call(
        kern,
        out_shape=jax.ShapeDtypeStruct((M, D), jnp.float32),
        grid=(M // tm,),
        in_specs=[rspec, rspec, pspec, pspec],
        out_specs=rspec,
        compiler_params=pltpu.CompilerParams(
            dimension_semantics=("parallel",),
            vmem_limit_bytes=_VMEM_LIMIT,
        ),
    )(x, y, gamma.reshape(1, D), beta.reshape(1, D))


# ----------------------------------------------------------------------------
# Parameters (deterministic, synthetic)
# ----------------------------------------------------------------------------
def init_params(key, config):
    D = config["d_model"]
    F = config["feature_size"]
    dff = config["d_ff"]
    max_len = config["max_len"] + (1 if config["is_cls_embedding"] else 0)
    n_layers = config["n_layers"]

    keys = jax.random.split(key, 4 + n_layers)

    def dense(k, shape):
        return jax.random.normal(k, shape, jnp.float32) * 0.02

    params = {
        "featByEmb": {"w": dense(keys[0], (F, D)), "b": jnp.zeros((D,), jnp.float32)},
        "cls_embedding": dense(keys[1], (1, D)),
        "pos_emb": dense(keys[2], (max_len, D)),
        "seg_emb": dense(keys[3], (2, D)),
        "emb_ln_g": jnp.ones((D,), jnp.float32),
        "emb_ln_b": jnp.zeros((D,), jnp.float32),
        "layers": [],
    }
    for i in range(n_layers):
        lk = jax.random.split(keys[4 + i], 6)
        wq, wk, wv = dense(lk[0], (D, D)), dense(lk[1], (D, D)), dense(lk[2], (D, D))
        params["layers"].append({
            # fused QKV projection: one (D, 3D) matmul instead of three
            "w_qkv": jnp.concatenate([wq, wk, wv], axis=1),
            "b_qkv": jnp.zeros((3 * D,), jnp.float32),
            "wo": dense(lk[3], (D, D)), "bo": jnp.zeros((D,), jnp.float32),
            "ln1_g": jnp.ones((D,), jnp.float32), "ln1_b": jnp.zeros((D,), jnp.float32),
            "w1": dense(lk[4], (D, dff)), "b1": jnp.zeros((dff,), jnp.float32),
            "w2": dense(lk[5], (dff, D)), "b2": jnp.zeros((D,), jnp.float32),
            "ln2_g": jnp.ones((D,), jnp.float32), "ln2_b": jnp.zeros((D,), jnp.float32),
        })
    return params


# ----------------------------------------------------------------------------
# CoBERT forward
# ----------------------------------------------------------------------------
def cobert_forward(params, features, segment_ids, config):
    B, L, F = features.shape
    D = config["d_model"]
    H = config["n_heads"]

    # featByEmb Linear + GELU (fused tiled matmul kernel)
    x = fused_linear(features.reshape(B * L, F),
                     params["featByEmb"]["w"], params["featByEmb"]["b"],
                     activation="gelu").reshape(B, L, D)

    if config["is_cls_embedding"]:
        cls = jnp.broadcast_to(params["cls_embedding"][0][None, None, :], (B, 1, D))
        x = jnp.concatenate([cls, x], axis=1)
        segment_ids = jnp.concatenate(
            [jnp.zeros((B, 1), dtype=segment_ids.dtype), segment_ids], axis=1)
    Lp = x.shape[1]
    Lp_pad = ((Lp + 7) // 8) * 8     # sublane-align the sequence dimension

    # BERT embedding: + positional + segment, then LayerNorm
    pos_seg = params["pos_emb"][:Lp][None, :, :] + params["seg_emb"][segment_ids]
    if Lp_pad != Lp:
        pad = [(0, 0), (0, Lp_pad - Lp), (0, 0)]
        x = jnp.pad(x, pad)
        pos_seg = jnp.pad(pos_seg, pad)

    M = B * Lp_pad
    x = add_layernorm(x.reshape(M, D), pos_seg.reshape(M, D),
                      params["emb_ln_g"], params["emb_ln_b"])   # (M, D) flat rows

    for lp in params["layers"]:
        # fused QKV projection -> packed (B, Lp_pad, 3D), lane-dense
        qkv = fused_linear(x, lp["w_qkv"], lp["b_qkv"])
        ctx = attention(qkv.reshape(B, Lp_pad, 3 * D), H, Lp)   # (B, Lp_pad, D)
        # output projection + residual + LayerNorm fused as matmul epilogue
        x = fused_linear(ctx.reshape(M, D), lp["wo"], lp["bo"],
                         residual=x, ln=(lp["ln1_g"], lp["ln1_b"]))
        # position-wise FFN: GELU fused into first matmul,
        # residual + LayerNorm fused into the second
        h = fused_linear(x, lp["w1"], lp["b1"], activation="gelu")
        x = fused_linear(h, lp["w2"], lp["b2"],
                         residual=x, ln=(lp["ln2_g"], lp["ln2_b"]))

    # TODO(synk): for v6e/v7x a bf16 activation path (f32 accumulation is
    # already in place) would halve HBM/VMEM traffic; kept f32 to match the
    # PyTorch reference numerics.
    return x.reshape(B, Lp_pad, D)[:, :Lp, :]


# ----------------------------------------------------------------------------
if __name__ == "__main__":
    config = {
        "feature_size": 16,
        "d_model": 32,
        "n_heads": 4,
        "d_ff": 64,
        "n_layers": 2,
        "max_len": 8,
        "is_cls_embedding": True,
        "device": None,
    }

    key = jax.random.PRNGKey(0)
    k_feat, k_param = jax.random.split(key)
    B, L, F = 2, config["max_len"], config["feature_size"]
    features = jax.random.normal(k_feat, (B, L, F), jnp.float32)      # "input_ids"
    segment_ids = jnp.concatenate(
        [jnp.zeros((B, L // 2), jnp.int32), jnp.ones((B, L - L // 2), jnp.int32)],
        axis=1)

    params = init_params(k_param, config)
    out = cobert_forward(params, features, segment_ids, config)
    out = jax.block_until_ready(out)

    expected_L = L + 1  # CLS token prepended
    assert out.shape == (B, expected_L, config["d_model"]), out.shape
    assert bool(jnp.all(jnp.isfinite(out)))
    print("KERNEL_OK")
</pallas_src>

<mosaic_0001>
module attributes {stable_mosaic.version = 11 : i64} {
  func.func @kernel(%arg0: i32, %arg1: i32, %arg2: i32, %arg3: memref<16x16xf32, #tpu.memory_space<vmem>>, %arg4: memref<16x32xf32, #tpu.memory_space<vmem>>, %arg5: memref<1x32xf32, #tpu.memory_space<vmem>>, %arg6: memref<16x32xf32, #tpu.memory_space<vmem>>, %arg7: memref<16x32xf32, #tpu.memory_space<vmem>>) attributes {dimension_semantics = [#tpu.dimension_semantics<parallel>, #tpu.dimension_semantics<parallel>, #tpu.dimension_semantics<arbitrary>], iteration_bounds = array<i64: 1, 1, 1>, scalar_prefetch = 0 : i64, scratch_operands = 1 : i64, tpu.core_type = #tpu.core_type<tc>, window_params = [{transform_indices = @transform_0, window_bounds = array<i64: 16, 16>}, {transform_indices = @transform_1, window_bounds = array<i64: 16, 32>}, {transform_indices = @transform_2, window_bounds = array<i64: 1, 32>}, {transform_indices = @transform_3, window_bounds = array<i64: 16, 32>}]} {
    %c0_i32 = arith.constant 0 : i32
    %0 = arith.cmpi eq, %arg2, %c0_i32 : i32
    %1 = arith.extui %0 : i1 to i32
    %c0_i32_0 = arith.constant 0 : i32
    %2 = arith.cmpi ne, %1, %c0_i32_0 : i32
    scf.if %2 {
      %cst_10 = arith.constant 0.000000e+00 : f32
      %12 = vector.broadcast %cst_10 : f32 to vector<16x32xf32>
      %c0_11 = arith.constant 0 : index
      %c0_12 = arith.constant 0 : index
      %13 = vector.load %arg7[%c0_11, %c0_12] : memref<16x32xf32, #tpu.memory_space<vmem>>, vector<16x32xf32>
      tpu.vector_store %arg7[%c0_11, %c0_12], %12 {strides = array<i32>} : memref<16x32xf32, #tpu.memory_space<vmem>>, vector<16x32xf32>,
    } else {
    }
    %c0 = arith.constant 0 : index
    %c0_1 = arith.constant 0 : index
    %3 = vector.load %arg7[%c0, %c0_1] : memref<16x32xf32, #tpu.memory_space<vmem>>, vector<16x32xf32>
    %c0_2 = arith.constant 0 : index
    %c0_3 = arith.constant 0 : index
    %4 = vector.load %arg3[%c0_2, %c0_3] : memref<16x16xf32, #tpu.memory_space<vmem>>, vector<16x16xf32>
    %c0_4 = arith.constant 0 : index
    %c0_5 = arith.constant 0 : index
    %5 = vector.load %arg4[%c0_4, %c0_5] : memref<16x32xf32, #tpu.memory_space<vmem>>, vector<16x32xf32>
    %cst = arith.constant dense<0.000000e+00> : vector<16x32xf32>
    %6 = tpu.matmul %4, %5, %cst {dimension_numbers = #tpu.dot_dimension_numbers<[1], [0], [0], [1], [0, 0, 1, 1], [], []>} : vector<16x16xf32>, vector<16x32xf32>, vector<16x32xf32> -> vector<16x32xf32>
    %7 = arith.addf %3, %6 : vector<16x32xf32>
    %c0_6 = arith.constant 0 : index
    %c0_7 = arith.constant 0 : index
    %8 = vector.load %arg7[%c0_6, %c0_7] : memref<16x32xf32, #tpu.memory_space<vmem>>, vector<16x32xf32>
    tpu.vector_store %arg7[%c0_6, %c0_7], %7 {strides = array<i32>} : memref<16x32xf32, #tpu.memory_space<vmem>>, vector<16x32xf32>,
    %c0_i32_8 = arith.constant 0 : i32
    %9 = arith.cmpi eq, %arg2, %c0_i32_8 : i32
    %10 = arith.extui %9 : i1 to i32
    %c0_i32_9 = arith.constant 0 : i32
    %11 = arith.cmpi ne, %10, %c0_i32_9 : i32
    scf.if %11 {
      %c0_10 = arith.constant 0 : index
      %c0_11 = arith.constant 0 : index
      %12 = vector.load %arg7[%c0_10, %c0_11] : memref<16x32xf32, #tpu.memory_space<vmem>>, vector<16x32xf32>
      %c0_12 = arith.constant 0 : index
      %c0_13 = arith.constant 0 : index
      %13 = vector.load %arg5[%c0_12, %c0_13] : memref<1x32xf32, #tpu.memory_space<vmem>>, vector<1x32xf32>
      %14 = vector.broadcast %13 : vector<1x32xf32> to vector<16x32xf32>
      %15 = arith.addf %12, %14 : vector<16x32xf32>
      %cst_14 = arith.constant 5.000000e-01 : f32
      %16 = vector.broadcast %cst_14 : f32 to vector<16x32xf32>
      %17 = arith.mulf %16, %15 : vector<16x32xf32>
      %cst_15 = arith.constant 4.471500e-02 : f32
      %18 = vector.broadcast %cst_15 : f32 to vector<16x32xf32>
      %19 = arith.mulf %18, %15 : vector<16x32xf32>
      %20 = arith.mulf %19, %15 : vector<16x32xf32>
      %21 = arith.mulf %20, %15 : vector<16x32xf32>
      %22 = arith.addf %15, %21 : vector<16x32xf32>
      %cst_16 = arith.constant 0.797884583 : f32
      %23 = vector.broadcast %cst_16 : f32 to vector<16x32xf32>
      %24 = arith.mulf %23, %22 : vector<16x32xf32>
      %25 = math.tanh %24 : vector<16x32xf32>
      %cst_17 = arith.constant 1.000000e+00 : f32
      %26 = vector.broadcast %cst_17 : f32 to vector<16x32xf32>
      %27 = arith.addf %26, %25 : vector<16x32xf32>
      %28 = arith.mulf %17, %27 : vector<16x32xf32>
      %c0_18 = arith.constant 0 : index
      %c0_19 = arith.constant 0 : index
      %29 = vector.load %arg6[%c0_18, %c0_19] : memref<16x32xf32, #tpu.memory_space<vmem>>, vector<16x32xf32>
      tpu.vector_store %arg6[%c0_18, %c0_19], %28 {strides = array<i32>} : memref<16x32xf32, #tpu.memory_space<vmem>>, vector<16x32xf32>,
    } else {
    }
    return
  }
  func.func @transform_0(%arg0: i32, %arg1: i32, %arg2: i32) -> (i32, i32) {
    %c0_i32 = arith.constant 0 : i32
    return %arg0, %arg2 : i32, i32
  }
  func.func @transform_1(%arg0: i32, %arg1: i32, %arg2: i32) -> (i32, i32) {
    %c0_i32 = arith.constant 0 : i32
    return %arg2, %arg1 : i32, i32
  }
  func.func @transform_2(%arg0: i32, %arg1: i32, %arg2: i32) -> (i32, i32) {
    %c0_i32 = arith.constant 0 : i32
    %c0_i32_0 = arith.constant 0 : i32
    return %c0_i32, %arg1 : i32, i32
  }
  func.func @transform_3(%arg0: i32, %arg1: i32, %arg2: i32) -> (i32, i32) {
    %c0_i32 = arith.constant 0 : i32
    return %arg0, %arg1 : i32, i32
  }
}

</mosaic_0001>

<bundles_post_ra>
// kernel: tpu_custom_call.1
= control target key start
LH: loop header
LB: loop body
LE: loop exit
PB: predicated region body
PF: predicated region fallthrough
CT: control target
= control target key end

     0   :  { %8 = vsyncpa [#allocation4], 0  ;;  %s375_s0 = inlined_call_operand.hbm [shape: f32[16,16], index: 0, kind: input, shape index: {}]   ;;  %s376_s1 = inlined_call_operand.hbm [shape: f32[16,32], index: 1, kind: input, shape index: {}]   ;;  %s377_s2 = inlined_call_operand.vmem [shape: f32[1,32], index: 2, kind: input, shape index: {}]   ;;  %s378_s3 = inlined_call_operand.hbm [shape: f32[16,32], index: 3, kind: output, shape index: {}]  }
   0x1   :  { %9 = vsyncpa [#allocation7], 0 }
   0x2   :  { %10 = vsyncpa [#allocation5], 0  ;;  %s295_s12 = smov [#allocation3]   ;;  %s223_s16 = scalar_lea.hbm %s375_s0, 256 }
   0x3   :  { %s16_s13 = sshll.u32 %s295_s12, 4  ;;  %p224_p0 = scmp.ne.s32.totalorder %s375_s0, %s223_s16  ;;  %s17_s13 = int_to_ptr.vmem [resolvable:$true] %s16_s13 }
   0x4   :  { %p227_p1 = scmp.lt.u32.totalorder %s223_s16, %s375_s0 }
   0x6   :  { %p229_p2 = pnand %p227_p1, %p224_p0 }
   0x8   :  { %232 = shalt.err (!%p229_p2)
}
   0x9   :  { %s233_s21 = scalar_lea.vmem %s17_s13, 256  ;;  %p238_p4 = scmp.lt.s32.totalorder %s17_s13, %s17_s13 }
   0xa   :  { %p234_p3 = scmp.ne.s32.totalorder %s17_s13, %s233_s21  ;;  %p239_p5 = scmp.lt.s32.totalorder %s233_s21, %s233_s21 }
   0xc   :  { %p240_p6 = por %p239_p5, %p238_p4 }
   0xe   :  { %p241_p7 = pnand %p240_p6, %p234_p3 }
  0x10   :  { %244 = shalt.err (!%p241_p7)
}
  0x11   :  { %s296_s22 = smov 128   ;;  %s297_s23 = smov 8  }
  0x12   :  { %22 = dma.hbm_to_vmem [thread:$0]  %s375_s0, 256, %s17_s13, [#allocation4], %s296_s22, %s296_s22, %s297_s23  }
  0x13   :  { %s298_s26 = smov [#allocation6]   ;;  %s245_s30 = scalar_lea.hbm %s376_s1, 256 }
  0x14   :  { %s28_s27 = sshll.u32 %s298_s26, 4  ;;  %p246_p8 = scmp.ne.s32.totalorder %s376_s1, %s245_s30  ;;  %s29_s27 = int_to_ptr.vmem [resolvable:$true] %s28_s27 }
  0x15   :  { %p249_p9 = scmp.lt.u32.totalorder %s245_s30, %s376_s1 }
  0x17   :  { %p251_p10 = pnand %p249_p9, %p246_p8 }
  0x19   :  { %254 = shalt.err (!%p251_p10)
}
  0x1a   :  { %s255_s8 = scalar_lea.vmem %s29_s27, 256  ;;  %p260_p12 = scmp.lt.s32.totalorder %s29_s27, %s29_s27 }
  0x1b   :  { %p256_p11 = scmp.ne.s32.totalorder %s29_s27, %s255_s8  ;;  %p261_p13 = scmp.lt.s32.totalorder %s255_s8, %s255_s8 }
  0x1d   :  { %p262_p0 = por %p261_p13, %p260_p12 }
  0x1f   :  { %p263_p1 = pnand %p262_p0, %p256_p11 }
  0x21   :  { %266 = shalt.err (!%p263_p1)
}
  0x22   :  { %34 = dma.hbm_to_vmem [thread:$0]  %s376_s1, 256, %s29_s27, [#allocation7], %s296_s22, %s296_s22, %s297_s23  }
  0x23   :  { %289 = dma.done.wait [#allocation4], 256  }
  0x24   :  { %290 = vsyncadd [#allocation4], 4294967040 }
  0x25   :  { %291 = dma.done.wait [#allocation7], 256  }
  0x26   :  { %292 = vsyncadd [#allocation7], 4294967040  ;;  %vm47_vm0 = vcmask 261120   ;;  %v299_v0 = vmov 0.0   ;;  %vm56_vm1 = vcmask 130048   ;;  %v54_v1 = vld [vmem:[#allocation6] sm:$0xff] }
  0x27   :  { %49 = vst.msk [vmem:[#allocation2 + $0x8] sm:$0xff] %vm47_vm0, %v299_v0  ;;  %48 = vst.msk [vmem:[#allocation2] sm:$0xff] %vm47_vm0, %v299_v0  ;;  %v55_v2 = vld [vmem:[#allocation6 + $0x8] sm:$0xff]  ;;  %v52_v3 = vld [vmem:[#allocation3] sm:$0xff] }
  0x28   :  { %v209_v4 = vpack.c.bf16 %v55_v2, %v54_v1  ;;  %206 = vmatprep.mubr.msk.f32.mxu0 %vm56_vm1, %v52_v3  ;;  %v53_v5 = vld [vmem:[#allocation3 + $0x8] sm:$0xff]  ;;  %v197_v12 = vld [vmem:[%s377_s2] ss:$0 sm:$0xff]  ;;  %s300_s2 = smov [#allocation8]  }
  0x29   :  { %s182_s11 = sshll.u32 %s300_s2, 4  ;;  %s183_s11 = int_to_ptr.vmem [resolvable:$true] %s182_s11 }
  0x2a   :  { %210 = vmatprep.subr.bf16.mxu0 %v209_v4  ;;  %s267_s12 = scalar_lea.vmem %s183_s11, 256  ;;  %p272_p3 = scmp.lt.s32.totalorder %s183_s11, %s183_s11 }
  0x2b   :  { %212 = vmatpush3.bf16.msra.mxu0 %v209_v4  ;;  %p268_p2 = scmp.ne.s32.totalorder %s183_s11, %s267_s12  ;;  %p273_p4 = scmp.lt.s32.totalorder %s267_s12, %s267_s12 }
  0x2d   :  { %p274_p5 = por %p273_p4, %p272_p3 }
  0x2e   :  { %207 = vmatmul.mubr.msk.f32.vlgmr.msra.gmra.mrb[0].mxu0 %vm56_vm1, %v53_v5  ;;  %v51_v6 = vld [vmem:[#allocation2 + $0x8] sm:$0xff]  ;;  %v50_v7 = vld [vmem:[#allocation2] sm:$0xff] }
  0x2f   :  { %p275_p6 = pnand %p274_p5, %p268_p2 }
 0x101   :  { %v208_v8 = vpop.f32.mrb[0].mxu0 }
 0x102   :  { %v139_v9 = vadd.f32 %v208_v8, %v51_v6  ;;  %v129_v10 = vpop.f32.mrb[1].mxu0 }
 0x103   :  { %v138_v11 = vadd.f32 %v129_v10, %v50_v7 }
 0x104   :  { %142 = vst.msk [vmem:[#allocation2 + $0x8] sm:$0xff] %vm47_vm0, %v139_v9 }
 0x105   :  { %141 = vst.msk [vmem:[#allocation2] sm:$0xff] %vm47_vm0, %v138_v11 }
 0x10b   :  { %v147_v13 = vld [vmem:[#allocation2 + $0x8] sm:$0xff] }
 0x10c   :  { %v146_v14 = vld [vmem:[#allocation2] sm:$0xff]  ;;  %v156_v15 = vadd.f32 %v197_v12, %v147_v13 }
 0x10d   :  { %v155_v16 = vadd.f32 %v197_v12, %v146_v14 }
 0x10e   :  { %v160_v17 = vmul.f32 0.044715, %v156_v15  ;;  %v158_v29 = vmul.f32 0.5, %v156_v15 }
 0x10f   :  { %v159_v18 = vmul.f32 0.044715, %v155_v16  ;;  %v157_v31 = vmul.f32 0.5, %v155_v16 }
 0x110   :  { %v162_v19 = vmul.f32 %v160_v17, %v156_v15 }
 0x111   :  { %v161_v20 = vmul.f32 %v159_v18, %v155_v16 }
 0x112   :  { %v164_v21 = vmul.f32 %v162_v19, %v156_v15 }
 0x113   :  { %v163_v22 = vmul.f32 %v161_v20, %v155_v16 }
 0x114   :  { %v166_v23 = vadd.f32 %v164_v21, %v156_v15 }
 0x115   :  { %v165_v24 = vadd.f32 %v163_v22, %v155_v16 }
 0x116   :  { %v168_v25 = vmul.f32 0.7978846, %v166_v23 }
 0x117   :  { %v167_v26 = vmul.f32 0.7978846, %v165_v24 }
 0x118   :  { %219 = vtanh.f32 %v168_v25 }
 0x119   :  { %221 = vtanh.f32 %v167_v26 }
 0x122   :  { %v220_v27 = vpop.eup %219 }
 0x123   :  { %v222_v28 = vpop.eup %221  ;;  %v172_v30 = vadd.f32 1.0, %v220_v27 }
 0x124   :  { %v171_v32 = vadd.f32 1.0, %v222_v28 }
 0x125   :  { %v174_v33 = vmul.f32 %v172_v30, %v158_v29 }
 0x126   :  { %v173_v34 = vmul.f32 %v171_v32, %v157_v31 }
 0x127   :  { %176 = vst.msk [vmem:[#allocation8 + $0x8] sm:$0xff] %vm47_vm0, %v174_v33 }
 0x128   :  { %175 = vst.msk [vmem:[#allocation8] sm:$0xff] %vm47_vm0, %v173_v34 }
 0x129   :  { %278 = shalt.err (!%p275_p6)
}
 0x12a   :  { %s279_s15 = scalar_lea.hbm %s378_s3, 256 }
 0x12b   :  { %p280_p7 = scmp.ne.s32.totalorder %s378_s3, %s279_s15  ;;  %p283_p8 = scmp.lt.u32.totalorder %s279_s15, %s378_s3 }
 0x12d   :  { %p285_p9 = pnand %p283_p8, %p280_p7 }
 0x12f   :  { %288 = shalt.err (!%p285_p9)
}
 0x130   :  { %188 = dma.vmem_to_hbm [thread:$0]  %s183_s11, 256, %s378_s3, [#allocation5], %s296_s22, %s296_s22, %s297_s23  }
 0x131   :  { %293 = dma.done.wait [#allocation5], 256  }
 0x132   :  { %294 = vsyncadd [#allocation5], 4294967040 }
 0x133   :  { %192 = vsyncpa [#allocation4], 1 }
 0x134   :  { %193 = vsyncpa [#allocation7], 1 }
 0x135   :  { %194 = vsyncpa [#allocation5], 1 }

</bundles_post_ra>
